<compile_context>
chip_gen: v7x
topology: tpu7x:2x2x1
jax: 0.10.0
libtpu: 0.0.40
codegen_flags: <defaults>
</compile_context>

<pallas_src>
import functools

import jax
import jax.numpy as jnp
from jax.experimental import pallas as pl
from jax.experimental.pallas import tpu as pltpu


def _conv1x1_bn_kernel(w_ref, b_ref, x_ref, o_ref, *, c_in, c_out):
    # w_ref: SMEM (c_out, c_in)   conv weights with BN scale folded in
    # b_ref: SMEM (c_out,)        conv bias with BN scale/shift folded in
    # x_ref: VMEM (c_in,  TILE_M) channels-first pixel tile
    # o_ref: VMEM (c_out, TILE_M) channels-first output tile
    xs = [x_ref[ci:ci + 1, :] for ci in range(c_in)]          # each (1, TILE_M)
    rows = []
    for co in range(c_out):
        acc = xs[0] * w_ref[co, 0]
        for ci in range(1, c_in):
            acc = acc + xs[ci] * w_ref[co, ci]
        rows.append(acc + b_ref[co])
    o_ref[...] = jnp.concatenate(rows, axis=0).astype(o_ref.dtype)


def conv_bn_forward(x_nchw, w_oihw, b_o, bn_mean, bn_var, bn_weight, bn_bias,
                    eps=1e-5, max_tile_m=8192):
    N, C_in, H, W = x_nchw.shape
    C_out = w_oihw.shape[0]
    M = H * W

    # Fold eval-mode batch_norm and the conv bias into the weights on host:
    #   y = (conv(x) - mean) * gamma / sqrt(var + eps) + beta
    scale = bn_weight / jnp.sqrt(bn_var + eps)                  # (C_out,)
    w2d = w_oihw.reshape(C_out, C_in) * scale[:, None]          # (C_out, C_in)
    b_fused = b_o * scale + (bn_bias - bn_mean * scale)         # (C_out,)

    # Channels-first pixel layout: NCHW -> (N, C_in, H*W) is a pure reshape
    # (no data movement) and the kernel output is directly NCHW-ordered.
    x3d = x_nchw.reshape(N, C_in, M)

    # Tile the pixel axis (lane-dense).  If the full extent fits one tile we
    # use it directly (legal even when not a multiple of 128); otherwise the
    # tile is a multiple of 128 and Pallas masks the overhanging tail block.
    tile_m = M if M <= max_tile_m else max_tile_m
    num_m = pl.cdiv(M, tile_m)

    kernel = functools.partial(_conv1x1_bn_kernel, c_in=C_in, c_out=C_out)

    out3d = pl.pallas_call(
        kernel,
        out_shape=jax.ShapeDtypeStruct((N, C_out, M), jnp.float32),
        grid=(N, num_m),
        in_specs=[
            pl.BlockSpec(memory_space=pltpu.MemorySpace.SMEM),      # fused W
            pl.BlockSpec(memory_space=pltpu.MemorySpace.SMEM),      # fused b
            pl.BlockSpec((None, C_in, tile_m), lambda n, m: (n, 0, m)),
        ],
        out_specs=pl.BlockSpec((None, C_out, tile_m), lambda n, m: (n, 0, m)),
        compiler_params=pltpu.CompilerParams(
            dimension_semantics=("parallel", "parallel")),
    )(w2d, b_fused, x3d)

    return out3d.reshape(N, C_out, H, W)


if __name__ == "__main__":
    key = jax.random.PRNGKey(0)
    k_x, k_w, k_b = jax.random.split(key, 3)

    N, C_in, H, W = 2, 3, 16, 16
    C_out = 2

    x = jax.random.normal(k_x, (N, C_in, H, W), dtype=jnp.float32)

    # Deterministic Conv2d-style init (uniform in +/- 1/sqrt(fan_in)).
    fan_in = C_in * 1 * 1
    bound = 1.0 / (fan_in ** 0.5)
    w = jax.random.uniform(k_w, (C_out, C_in, 1, 1), jnp.float32, -bound, bound)
    b = jax.random.uniform(k_b, (C_out,), jnp.float32, -bound, bound)

    # batch_norm args exactly as in the PyTorch forward (eval mode).
    bn_mean = jnp.zeros((C_out,), jnp.float32)
    bn_var = jnp.ones((C_out,), jnp.float32)
    bn_weight = jnp.ones((C_out,), jnp.float32)
    bn_bias = jnp.zeros((C_out,), jnp.float32)

    out = conv_bn_forward(x, w, b, bn_mean, bn_var, bn_weight, bn_bias)
    jax.block_until_ready(out)

    # Pure-JAX reference of the same fused math (eval-mode BN with mean=0,
    # var=1, weight=1, bias=0  =>  divide by sqrt(1 + eps)).
    ref = (jnp.einsum("oi,nihw->nohw", w.reshape(C_out, C_in), x)
           + b[None, :, None, None]) / jnp.sqrt(1.0 + 1e-5)
    assert jnp.allclose(out, ref, atol=1e-5, rtol=1e-5)

    print("KERNEL_OK")
</pallas_src>

<mosaic_0001>
module attributes {stable_mosaic.version = 11 : i64} {
  func.func @_conv1x1_bn_kernel(%arg0: i32, %arg1: i32, %arg2: memref<2x3xf32, #tpu.memory_space<smem>>, %arg3: memref<2xf32, #tpu.memory_space<smem>>, %arg4: memref<1x3x256xf32, #tpu.memory_space<vmem>>, %arg5: memref<1x2x256xf32, #tpu.memory_space<vmem>>) attributes {dimension_semantics = [#tpu.dimension_semantics<parallel>, #tpu.dimension_semantics<parallel>], iteration_bounds = array<i64: 2, 1>, scalar_prefetch = 0 : i64, scratch_operands = 0 : i64, tpu.core_type = #tpu.core_type<tc>, window_params = [{transform_indices = @transform_0, window_bounds = array<i64: 2, 3>}, {transform_indices = @transform_1, window_bounds = array<i64: 2>}, {transform_indices = @transform_2, window_bounds = array<i64: 1, 3, 256>}, {transform_indices = @transform_3, window_bounds = array<i64: 1, 2, 256>}]} {
    %c0 = arith.constant 0 : index
    %c0_0 = arith.constant 0 : index
    %c0_1 = arith.constant 0 : index
    %0 = vector.load %arg4[%c0, %c0_0, %c0_1] : memref<1x3x256xf32, #tpu.memory_space<vmem>>, vector<1x1x256xf32>
    %1 = vector.shape_cast %0 : vector<1x1x256xf32> to vector<1x256xf32>
    %c0_2 = arith.constant 0 : index
    %c1 = arith.constant 1 : index
    %c0_3 = arith.constant 0 : index
    %2 = vector.load %arg4[%c0_2, %c1, %c0_3] : memref<1x3x256xf32, #tpu.memory_space<vmem>>, vector<1x1x256xf32>
    %3 = vector.shape_cast %2 : vector<1x1x256xf32> to vector<1x256xf32>
    %c0_4 = arith.constant 0 : index
    %c2 = arith.constant 2 : index
    %c0_5 = arith.constant 0 : index
    %4 = vector.load %arg4[%c0_4, %c2, %c0_5] : memref<1x3x256xf32, #tpu.memory_space<vmem>>, vector<1x1x256xf32>
    %5 = vector.shape_cast %4 : vector<1x1x256xf32> to vector<1x256xf32>
    %c0_6 = arith.constant 0 : index
    %c0_7 = arith.constant 0 : index
    %6 = memref.load %arg2[%c0_6, %c0_7] : memref<2x3xf32, #tpu.memory_space<smem>>
    %7 = vector.broadcast %6 : f32 to vector<1x256xf32>
    %8 = arith.mulf %1, %7 : vector<1x256xf32>
    %c0_8 = arith.constant 0 : index
    %c1_9 = arith.constant 1 : index
    %9 = memref.load %arg2[%c0_8, %c1_9] : memref<2x3xf32, #tpu.memory_space<smem>>
    %10 = vector.broadcast %9 : f32 to vector<1x256xf32>
    %11 = arith.mulf %3, %10 : vector<1x256xf32>
    %12 = arith.addf %8, %11 : vector<1x256xf32>
    %c0_10 = arith.constant 0 : index
    %c2_11 = arith.constant 2 : index
    %13 = memref.load %arg2[%c0_10, %c2_11] : memref<2x3xf32, #tpu.memory_space<smem>>
    %14 = vector.broadcast %13 : f32 to vector<1x256xf32>
    %15 = arith.mulf %5, %14 : vector<1x256xf32>
    %16 = arith.addf %12, %15 : vector<1x256xf32>
    %c0_12 = arith.constant 0 : index
    %17 = memref.load %arg3[%c0_12] : memref<2xf32, #tpu.memory_space<smem>>
    %18 = vector.broadcast %17 : f32 to vector<1x256xf32>
    %19 = arith.addf %16, %18 : vector<1x256xf32>
    %c1_13 = arith.constant 1 : index
    %c0_14 = arith.constant 0 : index
    %20 = memref.load %arg2[%c1_13, %c0_14] : memref<2x3xf32, #tpu.memory_space<smem>>
    %21 = vector.broadcast %20 : f32 to vector<1x256xf32>
    %22 = arith.mulf %1, %21 : vector<1x256xf32>
    %c1_15 = arith.constant 1 : index
    %c1_16 = arith.constant 1 : index
    %23 = memref.load %arg2[%c1_15, %c1_16] : memref<2x3xf32, #tpu.memory_space<smem>>
    %24 = vector.broadcast %23 : f32 to vector<1x256xf32>
    %25 = arith.mulf %3, %24 : vector<1x256xf32>
    %26 = arith.addf %22, %25 : vector<1x256xf32>
    %c1_17 = arith.constant 1 : index
    %c2_18 = arith.constant 2 : index
    %27 = memref.load %arg2[%c1_17, %c2_18] : memref<2x3xf32, #tpu.memory_space<smem>>
    %28 = vector.broadcast %27 : f32 to vector<1x256xf32>
    %29 = arith.mulf %5, %28 : vector<1x256xf32>
    %30 = arith.addf %26, %29 : vector<1x256xf32>
    %c1_19 = arith.constant 1 : index
    %31 = memref.load %arg3[%c1_19] : memref<2xf32, #tpu.memory_space<smem>>
    %32 = vector.broadcast %31 : f32 to vector<1x256xf32>
    %33 = arith.addf %30, %32 : vector<1x256xf32>
    %34 = tpu.concatenate %19, %33 in 0 : vector<1x256xf32>, vector<1x256xf32> -> vector<2x256xf32>
    %c0_20 = arith.constant 0 : index
    %c0_21 = arith.constant 0 : index
    %c0_22 = arith.constant 0 : index
    %35 = vector.load %arg5[%c0_20, %c0_21, %c0_22] : memref<1x2x256xf32, #tpu.memory_space<vmem>>, vector<1x2x256xf32>
    %36 = vector.shape_cast %35 : vector<1x2x256xf32> to vector<2x256xf32>
    %37 = vector.shape_cast %34 : vector<2x256xf32> to vector<1x2x256xf32>
    tpu.vector_store %arg5[%c0_20, %c0_21, %c0_22], %37 {strides = array<i32>} : memref<1x2x256xf32, #tpu.memory_space<vmem>>, vector<1x2x256xf32>,
    return
  }
  func.func @transform_0(%arg0: i32, %arg1: i32) -> (i32, i32) {
    %c0_i32 = arith.constant 0 : i32
    %c0_i32_0 = arith.constant 0 : i32
    %c0_i32_1 = arith.constant 0 : i32
    return %c0_i32, %c0_i32_0 : i32, i32
  }
  func.func @transform_1(%arg0: i32, %arg1: i32) -> i32 {
    %c0_i32 = arith.constant 0 : i32
    %c0_i32_0 = arith.constant 0 : i32
    return %c0_i32 : i32
  }
  func.func @transform_2(%arg0: i32, %arg1: i32) -> (i32, i32, i32) {
    %c0_i32 = arith.constant 0 : i32
    %c0_i32_0 = arith.constant 0 : i32
    return %arg0, %c0_i32, %arg1 : i32, i32, i32
  }
  func.func @transform_3(%arg0: i32, %arg1: i32) -> (i32, i32, i32) {
    %c0_i32 = arith.constant 0 : i32
    %c0_i32_0 = arith.constant 0 : i32
    return %arg0, %c0_i32, %arg1 : i32, i32, i32
  }
}

</mosaic_0001>

<bundles_post_ra>
// kernel: tpu_custom_call.1
= control target key start
LH: loop header
LB: loop body
LE: loop exit
PB: predicated region body
PF: predicated region fallthrough
CT: control target
= control target key end

     0   :  { %8 = vsyncpa [#allocation4], 0  ;;  %s811_s0 = inlined_call_operand.vmem [shape: f32[2,3], index: 0, kind: input, shape index: {}]   ;;  %s812_s1 = inlined_call_operand.vmem [shape: f32[2], index: 1, kind: input, shape index: {}]   ;;  %s813_s2 = inlined_call_operand.vmem [shape: f32[2,3,256], index: 2, kind: input, shape index: {}]   ;;  %s814_s3 = inlined_call_operand.hbm [shape: f32[2,2,256], index: 3, kind: output, shape index: {}]  }
   0x1   :  { %9 = vsyncpa [#allocation6], 0 }
   0x2   :  { %10 = vsyncpa [#allocation3], 0 }
   0x3   :  { %12 = vsyncpa [#allocation3 + $0x1], 0  ;;  %s657_s12 = smov 0   ;;  %s659_s13 = smov 0  }
   0x4   :  { %s661_s14 = smov 0   ;;  %s663_s15 = smov 0  }
   0x5   :  { %s665_s16 = smov 0   ;;  %s667_s17 = smov 0  }
   0x6 LB: > { %s412_s18 = sadd.s32 4294967295, %s632_s17   ;;  %s413_s19 = sadd.s32 4294967294, %s632_s17   ;;  %s632_s17 = sphi %s667_s17, %s18_s17   ;;  %s628_s16 = sphi %s665_s16, %s832_s16   ;;  %s624_s15 = sphi %s663_s15, %s831_s15   ;;  %s620_s14 = sphi %s661_s14, %s830_s14   ;;  %s616_s13 = sphi %s659_s13, %s829_s13   ;;  %s612_s12 = sphi %s657_s12, %s828_s12  }
   0x7   : > { %s30_s20 = sadd.s32 1, %s628_s16  ;;  %s109_s21 = sadd.s32 1, %s620_s14 }
   0x8   : > { %p32_p0 = scmp.ge.s32.totalorder %s30_s20, 2  ;;  %p119_p1 = scmp.ne.s32.totalorder %s620_s14, %s616_s13 }
   0x9   : > { %p120_p2 = scmp.eq.s32.totalorder %s412_s18, 1  ;;  %p125_p3 = scmp.ne.s32.totalorder %s616_s13, %s612_s12 }
   0xa   : > { %s834_s20 = smov (%p32_p0, %s30_s20), 0  ;;  %p126_p5 = scmp.eq.s32.totalorder %s413_s19, 1 }
   0xb   : > { %p697_p4 = por %p120_p2, %p119_p1  ;;  %s104_s23 = ssub.s32 %s628_s16, %s834_s20 }
   0xc   : > { %p414_p6 = scmp.ge.s32.totalorder %s632_s17, 1  ;;  %p107_p7 = scmp.eq.s32.totalorder %s104_s23, 0 }
   0xd   : > { %s819_s22 = scalar_select %p697_p4, 1, 0 }
   0xe   : > { %p704_p8 = por %p126_p5, %p125_p3  ;;  %p133_p9 = scmp.lt.s32.totalorder %s632_s17, 3 }
   0xf   : > { %s710_s25 = scalar_select %p107_p7, %s620_s14, %s109_s21  }
  0x10   : > { %s820_s24 = scalar_select %p704_p8, 1, 0 }
  0x11   : > { %p712_p10 = pnand %p414_p6, %p133_p9  ;;  %p716_p11 = scmp.eq.s32.totalorder %s412_s18, 0 }
  0x12   : > { %s146_s30 = sshll.u32 %s811_s0, 4  ;;  %s157_s6 = sshll.u32 %s812_s1, 4  ;;  %s147_s30 = int_to_ptr.vmem [resolvable:$true] %s146_s30  ;;  %s158_s6 = int_to_ptr.vmem [resolvable:$true] %s157_s6 }
  0x13   : > { %s821_s26 = scalar_select %p712_p10, 1, 0 }
  0x14   : > { %s822_s27 = scalar_select %p716_p11, 1, 0 }
  0x15   : > { %p450_p12 = pneg %p712_p10  ;;  %s516_s8 = scalar_lea.vmem %s147_s30, 32 }
  0x16   : > { %p517_p0 = scmp.ne.s32.totalorder %s147_s30, %s516_s8  ;;  %p524_p5 = scmp.lt.s32.totalorder %s147_s30, %s147_s30 }
  0x17   : > { %p730_p13 = pnand %p716_p11, %p450_p12  ;;  %p525_p6 = scmp.lt.s32.totalorder %s516_s8, %s516_s8 }
  0x19   : > { %p518_p1 = pneg %p730_p13  ;;  %p526_p7 = por %p525_p6, %p524_p5 }
  0x1b   : > { %p519_p2 = pnand %p518_p1, %p517_p0 }
  0x1d   : > { %p520_p3 = pneg %p519_p2 }
  0x1f   : > { %p527_p9 = pnand %p526_p7, %p520_p3 }
  0x21   : > { %530 = shalt.err (!%p527_p9)
}
  0x22   : > { %s634_s9 = smov [#allocation2]   ;;  %s531_s10 = scalar_lea.vmem %s158_s6, 16 }
  0x23   : > { %453 = dma.vmem_to_smem (!%p730_p13), %s147_s30, 32, %s634_s9, [#allocation4]  }
  0x24   : > { %p532_p12 = scmp.ne.s32.totalorder %s158_s6, %s531_s10  ;;  %p539_p11 = scmp.lt.s32.totalorder %s158_s6, %s158_s6 }
  0x25   : > { %p540_p10 = scmp.lt.s32.totalorder %s531_s10, %s531_s10 }
  0x26   : > { %p534_p8 = pnand %p532_p12, %p518_p1 }
  0x27   : > { %p541_p0 = por %p540_p10, %p539_p11 }
  0x28   : > { %p535_p4 = pneg %p534_p8 }
  0x2a   : > { %p542_p2 = pnand %p541_p0, %p535_p4 }
  0x2c   : > { %545 = shalt.err (!%p542_p2)
}
  0x2d   : > { %s635_s11 = smov [#allocation5]   ;;  %p824_p3 = scmp.ne.s32.totalorder %s821_s26, 0 }
  0x2e   : > { %456 = dma.vmem_to_smem (!%p730_p13), %s158_s6, 16, %s635_s11, [#allocation6]  }
  0x2f   : > { %183 = sbr.rel (%p824_p3) target bundleno = 97 (0x61), region = 32  ;;  %p825_p5 = scmp.ne.s32.totalorder (!%p824_p3), %s822_s27, 0 }
  0x36   : > { %599 = dma.done.wait (%p825_p5), [#allocation4], 32  }
  0x37   : > { %601 = vsyncadd (%p825_p5), [#allocation4], 4294967264 }
  0x38   : > { %603 = dma.done.wait (%p825_p5), [#allocation6], 16  }
  0x39   : > { %605 = vsyncadd (%p825_p5), [#allocation6], 4294967280 }
  0x3a   : > { %193 = sfence }
  0x3b   : > { %p217_p4 = scmp.lt.s32.totalorder %s624_s15, 1  ;;  %s232_s18 = sld [smem:[#allocation2]]  ;;  %v261_v0 = vlaneseq  ;;  %vm282_vm0 = vcmask 1040384  }
  0x3c   : > { %s426_s19 = sld [smem:[#allocation2 + $0x1]]  ;;  %s427_s23 = sld [smem:[#allocation2 + $0x2]] }
  0x3d   : > { %s218_s21 = scalar_select %p217_p4, %s624_s15, 1  ;;  %v262_v9 = vshrl.u32 %v261_v0, 7 }
  0x3e   : > { %s243_s26 = sld [smem:[#allocation5]]  ;;  %s429_s6 = sld [smem:[#allocation2 + $0x81]] }
  0x3f   : > { %s438_s28 = sshll.u32 %s218_s21, 3  ;;  %s428_s29 = sld [smem:[#allocation2 + $0x80]]  ;;  %v263_v19 = vsub.s32 0, %v262_v9  ;;  %v267_v23 = vsub.s32 1, %v262_v9 }
  0x40   : > { %s224_s5 = scalar_lea.vmem %s813_s2, %s438_s28  ;;  %s430_s27 = sld [smem:[#allocation2 + $0x82]] }
  0x41   : > { %v227_v1 = vld [vmem:[%s224_s5] ss:$4 sm:$0x3]  ;;  %v424_v2 = vld [vmem:[%s224_s5 + $0x1] ss:$4 sm:$0x3]  ;;  %v233_v3 = vstv %s232_s18 }
  0x42   : > { %v425_v4 = vld [vmem:[%s224_s5 + $0x2] ss:$4 sm:$0x3]  ;;  %v234_v5 = vmul.f32 %v233_v3, %v227_v1  ;;  %v236_v6 = vstv %s426_s19  ;;  %s431_s7 = sld [smem:[#allocation5 + $0x1]]  ;;  %v240_v8 = vstv %s427_s23  ;;  %s213_s8 = sand.u32 1, %s616_s13  }
  0x43   : > { %v237_v7 = vmul.f32 %v424_v2, %v236_v6  ;;  %v241_v11 = vmul.f32 %v425_v4, %v240_v8  ;;  %s421_s9 = sshll.u32 %s213_s8, 2  ;;  %s439_s18 = sshll.u32 %s624_s15, 6 }
  0x44   : > { %v244_v13 = vstv %s243_s26  ;;  %v250_v15 = vstv %s429_s6  ;;  %s215_s10 = scalar_lea.vmem [#allocation7], %s421_s9  ;;  %s764_s23 = scalar_lea.hbm %s814_s3, %s439_s18 }
  0x45   : > { %v238_v10 = vadd.f32 %v237_v7, %v234_v5  ;;  %v247_v12 = vstv %s428_s29  ;;  %v251_v17 = vmul.f32 %v424_v2, %v250_v15  ;;  %s314_s11 = sshll.u32 %s215_s10, 4  ;;  %s298_s26 = scalar_lea.sflag [#allocation3], %s213_s8  ;;  %s759_s11 = int_to_ptr.vmem [resolvable:$true] %s314_s11 }
  0x46   : > { %v248_v14 = vmul.f32 %v247_v12, %v227_v1  ;;  %v254_v18 = vstv %s430_s27  ;;  %s546_s28 = scalar_lea.vmem %s759_s11, 64  ;;  %p826_p10 = scmp.ne.s32.totalorder %s819_s22, 0 }
  0x47   : > { %v242_v16 = vadd.f32 %v241_v11, %v238_v10  ;;  %v255_v22 = vmul.f32 %v425_v4, %v254_v18  ;;  %p547_p8 = scmp.ne.s32.totalorder %s759_s11, %s546_s28  ;;  %s636_s15 = smov [#allocation7]  }
  0x48   : > { %v252_v21 = vadd.f32 %v251_v17, %v248_v14  ;;  %v258_v24 = vstv %s431_s7  ;;  %s550_s29 = sshll.u32 %s636_s15, 4  ;;  %s551_s29 = int_to_ptr.vmem [resolvable:$false] %s550_s29 }
  0x49   : > { %v245_v20 = vadd.f32 %v244_v13, %v242_v16  ;;  %p548_p11 = pnand %p547_p8, %p826_p10  ;;  %s552_s30 = scalar_lea.vmem %s551_s29, 128 }
  0x4a   : > { %v256_v25 = vadd.f32 %v255_v22, %v252_v21  ;;  %p553_p1 = scmp.lt.s32.totalorder %s759_s11, %s551_s29  ;;  %p554_p6 = scmp.lt.s32.totalorder %s552_s30, %s546_s28 }
  0x4b   : > { %v264_v27 = vrot.slane %v245_v20, %v263_v19  ;;  %v268_v28 = vrot.slane %v245_v20, %v267_v23  ;;  %p549_p13 = pneg %p548_p11 }
  0x4c   : > { %v259_v26 = vadd.f32 %v258_v24, %v256_v25  ;;  %p555_p7 = por %p554_p6, %p553_p1 }
  0x4e   : > { %v275_v29 = vrot.slane %v259_v26, %v263_v19  ;;  %v279_v30 = vrot.slane %v259_v26, %v267_v23  ;;  %p556_p9 = pnand %p555_p7, %p549_p13 }
  0x50   : > { %v283_v31 = vsel %vm282_vm0, %v264_v27, %v275_v29  ;;  %v284_v32 = vsel %vm282_vm0, %v268_v28, %v279_v30 }
  0x51   : > { %v287_v33 = vcombine.low %v283_v31, %v284_v32 }
  0x53   : > { %432 = vst.sshfl [vmem:[%s215_s10] sm:$0x33 pattern:$0x76325410] %v287_v33 }
  0x54   : > { %559 = shalt.err (!%p556_p9)
}
  0x55   : > { %s560_s4 = scalar_lea.hbm %s764_s23, 64  ;;  %s564_s27 = scalar_lea.hbm %s814_s3, 128 }
  0x56   : > { %p561_p12 = scmp.ne.s32.totalorder %s764_s23, %s560_s4  ;;  %p565_p3 = scmp.lt.u32.totalorder %s764_s23, %s814_s3 }
  0x57   : > { %p566_p5 = scmp.lt.u32.totalorder %s564_s27, %s560_s4  ;;  %p568_p8 = scmp.lt.u32.totalorder %s560_s4, %s764_s23 }
  0x58   : > { %p562_p0 = pnand %p561_p12, %p826_p10 }
  0x59   : > { %p567_p4 = por %p566_p5, %p565_p3 }
  0x5a   : > { %p563_p2 = pneg %p562_p0 }
  0x5b   : > { %p569_p11 = por %p568_p8, %p567_p4 }
  0x5d   : > { %p570_p13 = pnand %p569_p11, %p563_p2 }
  0x5f   : > { %573 = shalt.err (!%p570_p13)
}
  0x60   : > { %448 = dma.vmem_to_hbm [thread:$0]  (%p826_p10), %s759_s11, 64, %s764_s23, %s298_s26  }
  0x61 PF: > { %p465_p1 = scmp.ge.s32.totalorder %s632_s17, 2  ;;  %s326_s9 = sand.u32 1, %s612_s12  }
  0x62   : > { %p827_p6 = scmp.ne.s32.totalorder %s820_s24, 0  ;;  %s327_s10 = scalar_lea.sflag [#allocation3], %s326_s9 }
  0x64   : > { %p458_p7 = pnand %p465_p1, %p827_p6 }
  0x66   : > { %607 = dma.done.wait (!%p458_p7), %s327_s10, 64  }
  0x67   : > { %609 = vsyncadd (!%p458_p7), %s327_s10, 4294967232  ;;  %s18_s17 = sadd.s32 1, %s632_s17   ;;  %s828_s12 = smov %s616_s13 }
  0x68   : > { %p15_p9 = scmp.ge.s32.totalorder %s18_s17, 4   ;;  %s829_s13 = smov %s620_s14 }
  0x69   : > { %s830_s14 = smov %s710_s25  ;;  %s831_s15 = smov %s628_s16 }
  0x6a   : > { %s832_s16 = smov %s834_s20  ;;  %17 = sbr.rel (!%p15_p9) target bundleno = 6 (0x6), region = 78 }
  0x71   :  { %332 = vsyncpa [#allocation3], 1 }
  0x72   :  { %334 = vsyncpa [#allocation3 + $0x1], 1 }
  0x73   :  { %335 = vsyncpa [#allocation4], 1 }
  0x74   :  { %337 = vsyncpa [#allocation4 + $0x1], 1 }
  0x75   :  { %338 = vsyncpa [#allocation6], 1 }

</bundles_post_ra>
